<compile_context>
chip_gen: v6e
topology: v6e:2x2x1
jax: 0.10.0
libtpu: 0.0.40
codegen_flags: <defaults>
</compile_context>

<pallas_src>
import functools

import jax
import jax.numpy as jnp
from jax.experimental import pallas as pl
from jax.experimental.pallas import tpu as pltpu


_H1 = 128      # fc1 out
_H2 = 64       # fc2 out (logical)
_H2P = 128     # fc2 out padded to full lane width


def _make_kernel(n_x):
    """Fused 3-layer MLP over one batch tile.

    refs = (x_0..x_{n_x-1}, w1_0..w1_{n_x-1}, b1, w2, b2, w3_row, b3, out)
      x_k      : (TB, d_k)    VMEM  f32   (cast to bf16 in-kernel for the MXU)
      w1_k     : (d_k, 128)   VMEM  bf16
      b1       : (1, 128)     VMEM  f32
      w2       : (128, 128)   VMEM  bf16  (columns 64..127 are zero padding)
      b2       : (1, 128)     VMEM  f32   (lanes 64..127 zero)
      w3_row   : (1, 128)     VMEM  f32   (fc3 weight row, lanes 64..127 zero)
      b3       : (1, 1)       SMEM  f32   (scalar)
      out      : (1, TB)      VMEM  f32   (lane-dense sigmoid outputs)
    """

    def kernel(*refs):
        x_refs = refs[:n_x]
        w1_refs = refs[n_x:2 * n_x]
        b1_ref, w2_ref, b2_ref, w3_ref, b3_ref, o_ref = refs[2 * n_x:]

        # fc1 (+ fused concat as sum of per-chunk matmuls) + relu        (MXU, bf16 in / f32 acc)
        h1 = b1_ref[...]                                             # (1, 128) f32
        for x_ref, w_ref in zip(x_refs, w1_refs):
            h1 = h1 + jnp.dot(x_ref[...].astype(jnp.bfloat16), w_ref[...],
                              preferred_element_type=jnp.float32)
        h1 = jnp.maximum(h1, 0.0)                                    # (TB, 128) f32

        # fc2 + relu, output lane-padded to 128                        (MXU, bf16 in / f32 acc)
        h2 = jnp.dot(h1.astype(jnp.bfloat16), w2_ref[...],
                     preferred_element_type=jnp.float32) + b2_ref[...]
        h2 = jnp.maximum(h2, 0.0)                                    # (TB, 128) f32

        # fc3 (out_features = 1) on VPU/XLU: weight-row multiply + lane reduce.
        # Padded lanes of w3 are zero, so they contribute nothing.
        h3 = jnp.sum(h2 * w3_ref[...], axis=-1) + b3_ref[0, 0]       # (TB,)

        # Lane-dense store: one (1, TB) row of sigmoid outputs per grid step.
        o_ref[...] = jax.nn.sigmoid(h3)[None, :]

    return kernel


def _round_up(x, m):
    return ((x + m - 1) // m) * m


def _cdiv(a, b):
    return -(-a // b)


def _choose_tiling(B):
    """Pick (TB, B_pad). TB is always a multiple of 128 (lane-dense output blocks)."""
    TB_MAX = 1024
    b128 = _round_up(B, 128)
    if b128 <= 128:
        return 128, 128                            # single 128-row tile
    if b128 <= 2 * TB_MAX:
        tb = _round_up(_cdiv(b128, 2), 128)        # exactly 2 tiles -> both v7x TCs busy
        return tb, 2 * tb
    return TB_MAX, _round_up(B, TB_MAX)            # large batch: 1024-row tiles


@functools.partial(jax.jit, static_argnames=("if_state_only",))
def discriminator_forward(state, action, params, if_state_only=False):
    """Forward pass matching Discriminator.forward(state, action)."""
    w1, b1, w2, b2, w3, b3 = params
    B, dim_state = state.shape

    if if_state_only:
        x_list = [state]
        w1_list = [w1]                                # (dim_state, 128)
    else:
        x_list = [state, action]
        w1_list = [w1[:dim_state], w1[dim_state:]]    # split fc1 weight -> fused concat

    # --- batch tiling -------------------------------------------------------
    TB, B_pad = _choose_tiling(B)
    grid = (B_pad // TB,)
    if B_pad != B:
        x_list = [jnp.pad(x, ((0, B_pad - B), (0, 0))) for x in x_list]

    # --- weight prep: bf16 MXU operands, 128-lane padded fc2/fc3 path --------
    w1_list = [w.astype(jnp.bfloat16) for w in w1_list]
    w2_p = jnp.pad(w2, ((0, 0), (0, _H2P - _H2))).astype(jnp.bfloat16)   # (128, 128)
    b2_p = jnp.pad(b2, ((0, 0), (0, _H2P - _H2)))                        # (1, 128) f32
    w3_row = jnp.pad(w3.reshape(1, _H2), ((0, 0), (0, _H2P - _H2)))      # (1, 128) f32

    kernel = _make_kernel(len(x_list))

    x_specs = [pl.BlockSpec((TB, x.shape[1]), lambda i: (i, 0)) for x in x_list]
    pinned = lambda shape: pl.BlockSpec(shape, lambda i: (0, 0))
    w1_specs = [pinned(w.shape) for w in w1_list]

    # --- advisory cost estimate (helps XLA overlap this tiny custom call) ----
    d_in = sum(x.shape[1] for x in x_list)
    flops = 2 * B_pad * (d_in * _H1 + _H1 * _H2P + _H2P)
    bytes_accessed = (
        4 * B_pad * (d_in + 1)                                # activations in + out (f32)
        + 2 * (d_in * _H1 + _H1 * _H2P)                       # bf16 weights
        + 4 * (_H1 + _H2P + _H2P + 1)                         # f32 biases + w3 row
    )
    cost = pl.CostEstimate(flops=flops, transcendentals=B_pad,
                           bytes_accessed=bytes_accessed)

    out = pl.pallas_call(
        kernel,
        out_shape=jax.ShapeDtypeStruct((1, B_pad), jnp.float32),
        grid=grid,
        in_specs=(
            x_specs
            + w1_specs
            + [
                pinned(b1.shape),                                   # (1, 128)
                pinned(w2_p.shape),                                 # (128, 128)
                pinned(b2_p.shape),                                 # (1, 128)
                pinned(w3_row.shape),                               # (1, 128)
                pl.BlockSpec(memory_space=pltpu.MemorySpace.SMEM),  # b3 scalar
            ]
        ),
        out_specs=pl.BlockSpec((1, TB), lambda i: (0, i)),
        compiler_params=pltpu.CompilerParams(
            dimension_semantics=("parallel",),
        ),
        cost_estimate=cost,
    )(*x_list, *w1_list, b1, w2_p, b2_p, w3_row, b3)

    return out[0, :B].reshape(B, 1)


def init_params(key, dim_in):
    """Deterministic init mimicking nn.Linear's default U(-1/sqrt(fan_in), 1/sqrt(fan_in))."""
    dims = [(dim_in, _H1), (_H1, _H2), (_H2, 1)]
    params = []
    for (fan_in, fan_out) in dims:
        key, kw, kb = jax.random.split(key, 3)
        bound = 1.0 / jnp.sqrt(jnp.float32(fan_in))
        w = jax.random.uniform(kw, (fan_in, fan_out), jnp.float32, -bound, bound)
        b = jax.random.uniform(kb, (1, fan_out), jnp.float32, -bound, bound)
        params += [w, b]
    return tuple(params)


def _reference(state, action, params, if_state_only):
    x = state if if_state_only else jnp.concatenate([state, action], axis=1)
    w1, b1, w2, b2, w3, b3 = params
    h1 = jnp.maximum(x @ w1 + b1, 0.0)
    h2 = jnp.maximum(h1 @ w2 + b2, 0.0)
    return jax.nn.sigmoid(h2 @ w3 + b3)


if __name__ == "__main__":
    key = jax.random.PRNGKey(0)
    k_s, k_a, k_p, k_s2, k_a2 = jax.random.split(key, 5)

    dim_state = 16
    dim_action = 8

    # bf16 MXU operands (f32 accumulation) -> loosened tolerance vs. pure-f32 reference.
    TOL = dict(atol=3e-2, rtol=3e-2)

    # --- check 1: small batch, state+action (single 128-row tile) -----------
    B = 8
    state = jax.random.normal(k_s, (B, dim_state), jnp.float32)
    action = jax.random.normal(k_a, (B, dim_action), jnp.float32)
    params = init_params(k_p, dim_state + dim_action)

    out = discriminator_forward(state, action, params, if_state_only=False)
    out = jax.block_until_ready(out)
    ref = _reference(state, action, params, False)
    assert out.shape == (B, 1)
    assert jnp.allclose(out, ref, **TOL)

    # --- check 2: larger batch exercising the 2-tile parallel grid + padding -
    B2 = 300
    state2 = jax.random.normal(k_s2, (B2, dim_state), jnp.float32)
    action2 = jax.random.normal(k_a2, (B2, dim_action), jnp.float32)
    out2 = discriminator_forward(state2, action2, params, if_state_only=False)
    out2 = jax.block_until_ready(out2)
    ref2 = _reference(state2, action2, params, False)
    assert out2.shape == (B2, 1)
    assert jnp.allclose(out2, ref2, **TOL)

    # --- check 3: if_state_only=True path ------------------------------------
    params_so = init_params(k_p, dim_state)
    out3 = discriminator_forward(state, action, params_so, if_state_only=True)
    out3 = jax.block_until_ready(out3)
    ref3 = _reference(state, action, params_so, True)
    assert out3.shape == (B, 1)
    assert jnp.allclose(out3, ref3, **TOL)

    print("KERNEL_OK")
</pallas_src>

<mosaic_0001>
module attributes {stable_mosaic.version = 11 : i64} {
  func.func @kernel(%arg0: i32, %arg1: memref<128x16xf32, #tpu.memory_space<vmem>>, %arg2: memref<128x8xf32, #tpu.memory_space<vmem>>, %arg3: memref<16x128xbf16, #tpu.memory_space<vmem>>, %arg4: memref<8x128xbf16, #tpu.memory_space<vmem>>, %arg5: memref<1x128xf32, #tpu.memory_space<vmem>>, %arg6: memref<128x128xbf16, #tpu.memory_space<vmem>>, %arg7: memref<1x128xf32, #tpu.memory_space<vmem>>, %arg8: memref<1x128xf32, #tpu.memory_space<vmem>>, %arg9: memref<1x1xf32, #tpu.memory_space<smem>>, %arg10: memref<1x128xf32, #tpu.memory_space<vmem>>) attributes {dimension_semantics = [#tpu.dimension_semantics<parallel>], iteration_bounds = array<i64: 1>, scalar_prefetch = 0 : i64, scratch_operands = 0 : i64, tpu.core_type = #tpu.core_type<tc>, window_params = [{transform_indices = @transform_0, window_bounds = array<i64: 128, 16>}, {transform_indices = @transform_1, window_bounds = array<i64: 128, 8>}, {pipeline_mode = #tpu.pipeline_mode<synchronous>, transform_indices = @transform_2, window_bounds = array<i64: 16, 128>}, {pipeline_mode = #tpu.pipeline_mode<synchronous>, transform_indices = @transform_3, window_bounds = array<i64: 8, 128>}, {pipeline_mode = #tpu.pipeline_mode<synchronous>, transform_indices = @transform_4, window_bounds = array<i64: 1, 128>}, {pipeline_mode = #tpu.pipeline_mode<synchronous>, transform_indices = @transform_5, window_bounds = array<i64: 128, 128>}, {pipeline_mode = #tpu.pipeline_mode<synchronous>, transform_indices = @transform_6, window_bounds = array<i64: 1, 128>}, {pipeline_mode = #tpu.pipeline_mode<synchronous>, transform_indices = @transform_7, window_bounds = array<i64: 1, 128>}, {transform_indices = @transform_8, window_bounds = array<i64: 1, 1>}, {transform_indices = @transform_9, window_bounds = array<i64: 1, 128>}]} {
    %c0 = arith.constant 0 : index
    %c0_0 = arith.constant 0 : index
    %0 = vector.load %arg5[%c0, %c0_0] : memref<1x128xf32, #tpu.memory_space<vmem>>, vector<1x128xf32>
    %c0_1 = arith.constant 0 : index
    %c0_2 = arith.constant 0 : index
    %1 = vector.load %arg1[%c0_1, %c0_2] : memref<128x16xf32, #tpu.memory_space<vmem>>, vector<128x16xf32>
    %2 = arith.truncf %1 : vector<128x16xf32> to vector<128x16xbf16>
    %c0_3 = arith.constant 0 : index
    %c0_4 = arith.constant 0 : index
    %3 = vector.load %arg3[%c0_3, %c0_4] : memref<16x128xbf16, #tpu.memory_space<vmem>>, vector<16x128xbf16>
    %cst = arith.constant dense<0.000000e+00> : vector<128x128xf32>
    %4 = tpu.matmul %2, %3, %cst {dimension_numbers = #tpu.dot_dimension_numbers<[1], [0], [0], [1], [0, 0, 1, 1], [], []>} : vector<128x16xbf16>, vector<16x128xbf16>, vector<128x128xf32> -> vector<128x128xf32>
    %5 = vector.broadcast %0 : vector<1x128xf32> to vector<128x128xf32>
    %6 = arith.addf %5, %4 : vector<128x128xf32>
    %c0_5 = arith.constant 0 : index
    %c0_6 = arith.constant 0 : index
    %7 = vector.load %arg2[%c0_5, %c0_6] : memref<128x8xf32, #tpu.memory_space<vmem>>, vector<128x8xf32>
    %8 = arith.truncf %7 : vector<128x8xf32> to vector<128x8xbf16>
    %c0_7 = arith.constant 0 : index
    %c0_8 = arith.constant 0 : index
    %9 = vector.load %arg4[%c0_7, %c0_8] : memref<8x128xbf16, #tpu.memory_space<vmem>>, vector<8x128xbf16>
    %cst_9 = arith.constant dense<0.000000e+00> : vector<128x128xf32>
    %10 = tpu.matmul %8, %9, %cst_9 {dimension_numbers = #tpu.dot_dimension_numbers<[1], [0], [0], [1], [0, 0, 1, 1], [], []>} : vector<128x8xbf16>, vector<8x128xbf16>, vector<128x128xf32> -> vector<128x128xf32>
    %11 = arith.addf %6, %10 : vector<128x128xf32>
    %cst_10 = arith.constant 0.000000e+00 : f32
    %12 = vector.broadcast %cst_10 : f32 to vector<128x128xf32>
    %13 = arith.maximumf %11, %12 : vector<128x128xf32>
    %14 = arith.truncf %13 : vector<128x128xf32> to vector<128x128xbf16>
    %c0_11 = arith.constant 0 : index
    %c0_12 = arith.constant 0 : index
    %15 = vector.load %arg6[%c0_11, %c0_12] : memref<128x128xbf16, #tpu.memory_space<vmem>>, vector<128x128xbf16>
    %cst_13 = arith.constant dense<0.000000e+00> : vector<128x128xf32>
    %16 = tpu.matmul %14, %15, %cst_13 {dimension_numbers = #tpu.dot_dimension_numbers<[1], [0], [0], [1], [0, 0, 1, 1], [], []>} : vector<128x128xbf16>, vector<128x128xbf16>, vector<128x128xf32> -> vector<128x128xf32>
    %c0_14 = arith.constant 0 : index
    %c0_15 = arith.constant 0 : index
    %17 = vector.load %arg7[%c0_14, %c0_15] : memref<1x128xf32, #tpu.memory_space<vmem>>, vector<1x128xf32>
    %18 = vector.broadcast %17 : vector<1x128xf32> to vector<128x128xf32>
    %19 = arith.addf %16, %18 : vector<128x128xf32>
    %cst_16 = arith.constant 0.000000e+00 : f32
    %20 = vector.broadcast %cst_16 : f32 to vector<128x128xf32>
    %21 = arith.maximumf %19, %20 : vector<128x128xf32>
    %c0_17 = arith.constant 0 : index
    %c0_18 = arith.constant 0 : index
    %22 = vector.load %arg8[%c0_17, %c0_18] : memref<1x128xf32, #tpu.memory_space<vmem>>, vector<1x128xf32>
    %23 = vector.broadcast %22 : vector<1x128xf32> to vector<128x128xf32>
    %24 = arith.mulf %21, %23 : vector<128x128xf32>
    %cst_19 = arith.constant dense<0.000000e+00> : vector<128xf32>
    %25 = vector.multi_reduction <add>, %24, %cst_19 [1] : vector<128x128xf32> to vector<128xf32>
    %c0_20 = arith.constant 0 : index
    %c0_21 = arith.constant 0 : index
    %26 = memref.load %arg9[%c0_20, %c0_21] : memref<1x1xf32, #tpu.memory_space<smem>>
    %27 = vector.broadcast %26 : f32 to vector<128xf32>
    %28 = arith.addf %25, %27 : vector<128xf32>
    %29 = arith.negf %28 : vector<128xf32>
    %30 = math.exp %29 : vector<128xf32>
    %cst_22 = arith.constant 1.000000e+00 : f32
    %31 = vector.broadcast %cst_22 : f32 to vector<128xf32>
    %32 = arith.addf %31, %30 : vector<128xf32>
    %33 = arith.divf %31, %32 : vector<128xf32>
    %34 = vector.shape_cast %33 : vector<128xf32> to vector<1x128xf32>
    %c0_23 = arith.constant 0 : index
    %c0_24 = arith.constant 0 : index
    %35 = vector.load %arg10[%c0_23, %c0_24] : memref<1x128xf32, #tpu.memory_space<vmem>>, vector<1x128xf32>
    tpu.vector_store %arg10[%c0_23, %c0_24], %34 {strides = array<i32>} : memref<1x128xf32, #tpu.memory_space<vmem>>, vector<1x128xf32>,
    return
  }
  func.func @transform_0(%arg0: i32) -> (i32, i32) {
    %c0_i32 = arith.constant 0 : i32
    %c0_i32_0 = arith.constant 0 : i32
    return %arg0, %c0_i32 : i32, i32
  }
  func.func @transform_1(%arg0: i32) -> (i32, i32) {
    %c0_i32 = arith.constant 0 : i32
    %c0_i32_0 = arith.constant 0 : i32
    return %arg0, %c0_i32 : i32, i32
  }
  func.func @transform_2(%arg0: i32) -> (i32, i32) {
    %c0_i32 = arith.constant 0 : i32
    %c0_i32_0 = arith.constant 0 : i32
    %c0_i32_1 = arith.constant 0 : i32
    return %c0_i32, %c0_i32_0 : i32, i32
  }
  func.func @transform_3(%arg0: i32) -> (i32, i32) {
    %c0_i32 = arith.constant 0 : i32
    %c0_i32_0 = arith.constant 0 : i32
    %c0_i32_1 = arith.constant 0 : i32
    return %c0_i32, %c0_i32_0 : i32, i32
  }
  func.func @transform_4(%arg0: i32) -> (i32, i32) {
    %c0_i32 = arith.constant 0 : i32
    %c0_i32_0 = arith.constant 0 : i32
    %c0_i32_1 = arith.constant 0 : i32
    return %c0_i32, %c0_i32_0 : i32, i32
  }
  func.func @transform_5(%arg0: i32) -> (i32, i32) {
    %c0_i32 = arith.constant 0 : i32
    %c0_i32_0 = arith.constant 0 : i32
    %c0_i32_1 = arith.constant 0 : i32
    return %c0_i32, %c0_i32_0 : i32, i32
  }
  func.func @transform_6(%arg0: i32) -> (i32, i32) {
    %c0_i32 = arith.constant 0 : i32
    %c0_i32_0 = arith.constant 0 : i32
    %c0_i32_1 = arith.constant 0 : i32
    return %c0_i32, %c0_i32_0 : i32, i32
  }
  func.func @transform_7(%arg0: i32) -> (i32, i32) {
    %c0_i32 = arith.constant 0 : i32
    %c0_i32_0 = arith.constant 0 : i32
    %c0_i32_1 = arith.constant 0 : i32
    return %c0_i32, %c0_i32_0 : i32, i32
  }
  func.func @transform_8(%arg0: i32) -> (i32, i32) {
    %c0_i32 = arith.constant 0 : i32
    %c0_i32_0 = arith.constant 0 : i32
    %c0_i32_1 = arith.constant 0 : i32
    return %c0_i32, %c0_i32_0 : i32, i32
  }
  func.func @transform_9(%arg0: i32) -> (i32, i32) {
    %c0_i32 = arith.constant 0 : i32
    %c0_i32_0 = arith.constant 0 : i32
    return %c0_i32, %arg0 : i32, i32
  }
}

</mosaic_0001>

<bundles_post_ra>
// kernel: discriminator_forward.1
= control target key start
LH: loop header
LB: loop body
LE: loop exit
PB: predicated region body
PF: predicated region fallthrough
CT: control target
= control target key end

     0   :  { %vm261_vm0 = vcmask 1043456   ;;  %vm236_vm1 = vcmask 64512   ;;  %vm67_vm2 = vcmask 130048   ;;  %vm782_vm3 = vcmask 130112   ;;  %s1439_s3 = inlined_call_operand.vmem [shape: bf16[8,128], index: 3, kind: input, shape index: {}]   ;;  %s1440_s2 = inlined_call_operand.vmem [shape: bf16[16,128], index: 2, kind: input, shape index: {}]   ;;  %s1441_s1 = inlined_call_operand.vmem [shape: f32[128,8], index: 1, kind: input, shape index: {}]   ;;  %s1442_s0 = inlined_call_operand.vmem [shape: f32[128,16], index: 0, kind: input, shape index: {}]   ;;  %s1443_s5 = inlined_call_operand.vmem [shape: bf16[128,128], index: 5, kind: input, shape index: {}]   ;;  %s1444_s4 = inlined_call_operand.vmem [shape: f32[1,128], index: 4, kind: input, shape index: {}]   ;;  %s1445_s6 = inlined_call_operand.vmem [shape: f32[1,128], index: 6, kind: input, shape index: {}]   ;;  %s1446_s7 = inlined_call_operand.vmem [shape: f32[1,128], index: 7, kind: input, shape index: {}]   ;;  %s1447_s8 = inlined_call_operand.<no memory space> [shape: f32[1,1], index: 8, kind: input, shape index: {}]   ;;  %s1448_s9 = inlined_call_operand.vmem [shape: f32[1,128], index: 9, kind: output, shape index: {}]  }
   0x1   :  { %v235_v0 = vld [vmem:[%s1439_s3] sm:$0xf]  ;;  %v212_v4 = vld [vmem:[%s1441_s1 + $0x8] sm:$0xff]  ;;  %v213_v6 = vld [vmem:[%s1441_s1 + $0x10] sm:$0xff]  ;;  %vm789_vm4 = vcmask 195712   ;;  %vm796_vm5 = vcmask 261312  }
   0x2   :  { %1050 = vmatprep.subr.msk.bf16.mxu1 %vm261_vm0, %v235_v0  ;;  %v263_v1 = vsel %vm261_vm0, %v235_v0, 0  ;;  %v1051_v2 = vld [vmem:[%s1440_s2] sm:$0xff]   ;;  %v214_v7 = vld [vmem:[%s1441_s1 + $0x18] sm:$0xff]  ;;  %v36_v10 = vld [vmem:[%s1442_s0 + $0x8] sm:$0xff]  ;;  %vm803_vm6 = vcmask 326912   ;;  %vm810_vm7 = vcmask 392512  }
   0x3   :  { %v211_v3 = vld [vmem:[%s1441_s1] sm:$0xff]  ;;  %985 = vmatpush3.bf16.msra.mxu1 %v263_v1  ;;  %966 = vmatprep.subr.bf16.mxu0 %v1051_v2  ;;  %v228_v9 = vpack.c.bf16 %v214_v7, %v213_v6  ;;  %v37_v11 = vld [vmem:[%s1442_s0 + $0x10] sm:$0xff]  ;;  %v38_v12 = vld [vmem:[%s1442_s0 + $0x18] sm:$0xff]  ;;  %vm817_vm8 = vcmask 458112   ;;  %vm824_vm9 = vcmask 523712   ;;  %vm831_vm10 = vcmask 589312  }
   0x4   :  { %v227_v5 = vpack.c.bf16 %v212_v4, %v211_v3  ;;  %v35_v8 = vld [vmem:[%s1442_s0] sm:$0xff]  ;;  %967 = vmatpush3.bf16.msra.mxu0 %v1051_v2  ;;  %v52_v14 = vpack.c.bf16 %v38_v12, %v37_v11  ;;  %v216_v16 = vld [vmem:[%s1441_s1 + $0x28] sm:$0xff]  ;;  %v217_v20 = vld [vmem:[%s1441_s1 + $0x30] sm:$0xff]  ;;  %vm838_vm11 = vcmask 654912   ;;  %vm845_vm12 = vcmask 720512  }
   0x5   :  { %v51_v13 = vpack.c.bf16 %v36_v10, %v35_v8  ;;  %v215_v15 = vld [vmem:[%s1441_s1 + $0x20] sm:$0xff]  ;;  %v40_v19 = vld [vmem:[%s1442_s0 + $0x28] sm:$0xff]  ;;  %v218_v21 = vld [vmem:[%s1441_s1 + $0x38] sm:$0xff]  ;;  %vm852_vm13 = vcmask 786112   ;;  %vm859_vm14 = vcmask 851712   ;;  %vm866_vm15 = vcmask 917312  }
   0x6   :  { %986 = vmatprep.mubr.msk.bf16.mxu1 %vm236_vm1, %v227_v5  ;;  %v229_v17 = vpack.c.bf16 %v216_v16, %v215_v15  ;;  %v39_v18 = vld [vmem:[%s1442_s0 + $0x20] sm:$0xff]  ;;  %v220_v24 = vld [vmem:[%s1441_s1 + $0x48] sm:$0xff]  ;;  %v41_v25 = vld [vmem:[%s1442_s0 + $0x30] sm:$0xff]  ;;  %v230_v27 = vpack.c.bf16 %v218_v21, %v217_v20  ;;  %vm873_vm0 = vcmask 982912  }
   0x7   :  { %987 = vmatmul.mubr.msk.bf16.vlgmr.msra.gmra.mxu1 %vm236_vm1, %v228_v9  ;;  %968 = vmatprep.mubr.msk.bf16.mxu0 %vm67_vm2, %v51_v13  ;;  %v53_v22 = vpack.c.bf16 %v40_v19, %v39_v18  ;;  %v219_v23 = vld [vmem:[%s1441_s1 + $0x40] sm:$0xff]  ;;  %v42_v26 = vld [vmem:[%s1442_s0 + $0x38] sm:$0xff]  ;;  %v44_v29 = vld [vmem:[%s1442_s0 + $0x48] sm:$0xff] }
   0x8   :  { %969 = vmatmul.mubr.msk.bf16.vlgmr.msra.gmra.mxu0 %vm67_vm2, %v52_v14  ;;  %990 = vmatprep.mubr.msk.bf16.mxu1 %vm236_vm1, %v229_v17  ;;  %v43_v28 = vld [vmem:[%s1442_s0 + $0x40] sm:$0xff]  ;;  %v231_v30 = vpack.c.bf16 %v220_v24, %v219_v23  ;;  %v54_v31 = vpack.c.bf16 %v42_v26, %v41_v25  ;;  %v221_v32 = vld [vmem:[%s1441_s1 + $0x50] sm:$0xff]  ;;  %v222_v33 = vld [vmem:[%s1441_s1 + $0x58] sm:$0xff] }
   0x9   :  { %972 = vmatprep.mubr.msk.bf16.mxu0 %vm67_vm2, %v53_v22  ;;  %v55_v34 = vpack.c.bf16 %v44_v29, %v43_v28  ;;  %v1052_v35 = vld [vmem:[%s1443_s5 + $0x38] sm:$0xff]   ;;  %v223_v36 = vld [vmem:[%s1441_s1 + $0x60] sm:$0xff]  ;;  %v1053_v37 = vld [vmem:[%s1443_s5 + $0x30] sm:$0xff]   ;;  %v232_v44 = vpack.c.bf16 %v222_v33, %v221_v32 }
   0xa   :  { %v45_v38 = vld [vmem:[%s1442_s0 + $0x50] sm:$0xff]  ;;  %v46_v39 = vld [vmem:[%s1442_s0 + $0x58] sm:$0xff]  ;;  %v224_v40 = vld [vmem:[%s1441_s1 + $0x68] sm:$0xff]  ;;  %1002 = vmatprep.subr.bf16.mxu0 %v1052_v35  ;;  %1034 = vmatprep.subr.bf16.mxu1 %v1052_v35 }
   0xb   :  { %v47_v41 = vld [vmem:[%s1442_s0 + $0x60] sm:$0xff]  ;;  %v48_v42 = vld [vmem:[%s1442_s0 + $0x68] sm:$0xff]  ;;  %1003 = vmatpush3.bf16.msra.mxu0 %v1052_v35  ;;  %1042 = vmatpush3.bf16.msra.mxu1 %v1052_v35  ;;  %v233_v45 = vpack.c.bf16 %v224_v40, %v223_v36  ;;  %v56_v46 = vpack.c.bf16 %v46_v39, %v45_v38  ;;  %v225_v49 = vld [vmem:[%s1441_s1 + $0x70] sm:$0xff] }
   0xc   :  { %v1054_v43 = vld [vmem:[%s1443_s5 + $0x28] sm:$0xff]   ;;  %1004 = vmatprep.subr.bf16.mxu0 %v1053_v37  ;;  %1035 = vmatprep.subr.bf16.mxu1 %v1053_v37  ;;  %v57_v47 = vpack.c.bf16 %v48_v42, %v47_v41  ;;  %v1055_v48 = vld [vmem:[%s1443_s5 + $0x20] sm:$0xff]   ;;  %v226_v50 = vld [vmem:[%s1441_s1 + $0x78] sm:$0xff] }
   0xd   :  { %v49_v51 = vld [vmem:[%s1442_s0 + $0x70] sm:$0xff]  ;;  %v50_v52 = vld [vmem:[%s1442_s0 + $0x78] sm:$0xff]  ;;  %v234_v53 = vpack.c.bf16 %v226_v50, %v225_v49  ;;  %v1058_v57 = vld [vmem:[%s1443_s5 + $0x8] sm:$0xff]  }
   0xe   :  { %v58_v54 = vpack.c.bf16 %v50_v52, %v49_v51  ;;  %v1056_v55 = vld [vmem:[%s1443_s5 + $0x18] sm:$0xff]   ;;  %v1057_v56 = vld [vmem:[%s1443_s5 + $0x10] sm:$0xff]   ;;  %v1059_v58 = vld [vmem:[%s1443_s5] sm:$0xff]  }
   0xf   :  { %991 = vmatmul.mubr.msk.bf16.gmra.mxu1 %vm236_vm1, %v230_v27  ;;  %1005 = vmatpush3.bf16.msra.mxu0 %v1053_v37  ;;  %v1319_v62 = vld [vmem:[%s1444_s4] ss:$0 sm:$0xff] }
  0x10   :  { %994 = vmatprep.mubr.msk.bf16.mxu1 %vm236_vm1, %v231_v30  ;;  %973 = vmatmul.mubr.msk.bf16.gmra.mxu0 %vm67_vm2, %v54_v31 }
  0x11   :  { %976 = vmatprep.mubr.msk.bf16.mxu0 %vm67_vm2, %v55_v34  ;;  %1006 = vmatprep.subr.bf16.mxu0 %v1054_v43 }
  0x12   :  { %1043 = vmatpush3.bf16.msra.mxu1 %v1053_v37 }
  0x13   :  { %1036 = vmatprep.subr.bf16.mxu1 %v1054_v43  ;;  %1007 = vmatpush3.bf16.msra.mxu0 %v1054_v43 }
  0x14   :  { %1008 = vmatprep.subr.bf16.mxu0 %v1055_v48 }
  0x16   :  { %1044 = vmatpush3.bf16.msra.mxu1 %v1054_v43 }
  0x17   :  { %995 = vmatmul.mubr.msk.bf16.gmra.mxu1 %vm236_vm1, %v232_v44  ;;  %1037 = vmatprep.subr.bf16.mxu1 %v1055_v48 }
  0x18   :  { %998 = vmatprep.mubr.msk.bf16.mxu1 %vm236_vm1, %v233_v45  ;;  %977 = vmatmul.mubr.msk.bf16.gmra.mxu0 %vm67_vm2, %v56_v46 }
  0x19   :  { %980 = vmatprep.mubr.msk.bf16.mxu0 %vm67_vm2, %v57_v47  ;;  %1009 = vmatpush3.bf16.msra.mxu0 %v1055_v48 }
  0x1a   :  { %1045 = vmatpush3.bf16.msra.mxu1 %v1055_v48  ;;  %1010 = vmatprep.subr.bf16.mxu0 %v1056_v55 }
  0x1b   :  { %1038 = vmatprep.subr.bf16.mxu1 %v1056_v55 }
  0x1d   :  { %1011 = vmatpush3.bf16.msra.mxu0 %v1056_v55 }
  0x1e   :  { %1046 = vmatpush3.bf16.msra.mxu1 %v1056_v55  ;;  %1012 = vmatprep.subr.bf16.mxu0 %v1057_v56 }
  0x1f   :  { %999 = vmatmul.mubr.msk.bf16.gmra.mxu1 %vm236_vm1, %v234_v53  ;;  %1039 = vmatprep.subr.bf16.mxu1 %v1057_v56  ;;  %vm880_vm1 = vcmask 1048512  }
  0x20   :  { %981 = vmatmul.mubr.msk.bf16.gmra.mxu0 %vm67_vm2, %v58_v54 }
  0x21   :  { %1013 = vmatpush3.bf16.msra.mxu0 %v1057_v56 }
  0x22   :  { %1047 = vmatpush3.bf16.msra.mxu1 %v1057_v56  ;;  %1014 = vmatprep.subr.bf16.mxu0 %v1058_v57 }
  0x23   :  { %1040 = vmatprep.subr.bf16.mxu1 %v1058_v57 }
  0x25   :  { %1015 = vmatpush3.bf16.msra.mxu0 %v1058_v57 }
  0x26   :  { %1048 = vmatpush3.bf16.msra.mxu1 %v1058_v57  ;;  %1016 = vmatprep.subr.bf16.mxu0 %v1059_v58 }
  0x27   :  { %1041 = vmatprep.subr.bf16.mxu1 %v1059_v58 }
  0x29   :  { %1017 = vmatpush3.bf16.msra.mxu0 %v1059_v58 }
  0x2a   :  { %1049 = vmatpush3.bf16.msra.mxu1 %v1059_v58 }
  0xc7   :  { %v988_v59 = vpop.f32.mrf.mxu1 }
  0xc8   :  { %v970_v60 = vpop.f32.mrf.mxu0 }
  0xc9   :  { %v299_v61 = vpop.f32.mrf.mxu1  ;;  %v197_v2 = vadd.f32 %v970_v60, %v1319_v62 }
  0xca   :  { %v126_v63 = vpop.f32.mrf.mxu0 }
  0xcb   :  { %v989_v0 = vpop.f32.mrf.mxu1  ;;  %v195_v1 = vadd.f32 %v1319_v62, %v126_v63  ;;  %v364_v11 = vadd.f32 %v988_v59, %v197_v2 }
  0xcc   :  { %v971_v3 = vpop.f32.mrf.mxu0 }
  0xcd   :  { %v302_v4 = vpop.f32.mrf.mxu1  ;;  %v198_v5 = vadd.f32 %v971_v3, %v1319_v62  ;;  %v362_v8 = vadd.f32 %v299_v61, %v195_v1  ;;  %v380_v21 = vmax.f32 %v364_v11, 0.0 }
  0xce   :  { %v129_v6 = vpop.f32.mrf.mxu0 }
  0xcf   :  { %v992_v7 = vpop.f32.mrf.mxu1  ;;  %v365_v9 = vadd.f32 %v989_v0, %v198_v5  ;;  %v196_v10 = vadd.f32 %v1319_v62, %v129_v6  ;;  %v378_v18 = vmax.f32 %v362_v8, 0.0 }
  0xd0   :  { %v974_v12 = vpop.f32.mrf.mxu0 }
  0xd1   :  { %v315_v13 = vpop.f32.mrf.mxu1  ;;  %v363_v14 = vadd.f32 %v302_v4, %v196_v10  ;;  %v381_v15 = vmax.f32 %v365_v9, 0.0  ;;  %v201_v22 = vadd.f32 %v974_v12, %v1319_v62 }
  0xd2   :  { %v142_v16 = vpop.f32.mrf.mxu0 }
  0xd3   :  { %v993_v17 = vpop.f32.mrf.mxu1  ;;  %v379_v19 = vmax.f32 %v363_v14, 0.0  ;;  %v199_v20 = vadd.f32 %v1319_v62, %v142_v16  ;;  %v395_v27 = vpack.c.bf16 %v381_v15, %v380_v21  ;;  %v368_v33 = vadd.f32 %v992_v7, %v201_v22  ;;  %v1340_v21 = vld [vmem:[%s1445_s6] ss:$0 sm:$0xff] }
  0xd4   :  { %v975_v23 = vpop.f32.mrf.mxu0 }
  0xd5   :  { %v318_v24 = vpop.f32.mrf.mxu1  ;;  %v202_v25 = vadd.f32 %v975_v23, %v1319_v62  ;;  %v394_v26 = vpack.c.bf16 %v379_v19, %v378_v18  ;;  %v366_v30 = vadd.f32 %v315_v13, %v199_v20  ;;  %v384_v43 = vmax.f32 %v368_v33, 0.0 }
  0xd6   :  { %v145_v28 = vpop.f32.mrf.mxu0 }
  0xd7   :  { %v996_v29 = vpop.f32.mrf.mxu1  ;;  %v369_v31 = vadd.f32 %v993_v17, %v202_v25  ;;  %v200_v32 = vadd.f32 %v1319_v62, %v145_v28  ;;  %1018 = vmatprep.mubr.bf16.mxu0 %v394_v26  ;;  %v382_v40 = vmax.f32 %v366_v30, 0.0 }
  0xd8   :  { %v978_v34 = vpop.f32.mrf.mxu0  ;;  %1019 = vmatmul.mubr.bf16.vlgmr.msra.gmra.mxu0 %v395_v27 }
  0xd9   :  { %v331_v35 = vpop.f32.mrf.mxu1  ;;  %v367_v36 = vadd.f32 %v318_v24, %v200_v32  ;;  %v385_v37 = vmax.f32 %v369_v31, 0.0  ;;  %v205_v44 = vadd.f32 %v978_v34, %v1319_v62  ;;  %v1346_v24 = vld [vmem:[%s1446_s7] ss:$0 sm:$0xff] }
  0xda   :  { %v158_v38 = vpop.f32.mrf.mxu0 }
  0xdb   :  { %v997_v39 = vpop.f32.mrf.mxu1  ;;  %v383_v41 = vmax.f32 %v367_v36, 0.0  ;;  %v203_v42 = vadd.f32 %v1319_v62, %v158_v38  ;;  %v397_v51 = vpack.c.bf16 %v385_v37, %v384_v43  ;;  %v372_v55 = vadd.f32 %v996_v29, %v205_v44 }
  0xdc   :  { %v979_v45 = vpop.f32.mrf.mxu0 }
  0xdd   :  { %v334_v46 = vpop.f32.mrf.mxu1  ;;  %v206_v47 = vadd.f32 %v979_v45, %v1319_v62  ;;  %v396_v48 = vpack.c.bf16 %v383_v41, %v382_v40  ;;  %v370_v52 = vadd.f32 %v331_v35, %v203_v42  ;;  %v388_v1 = vmax.f32 %v372_v55, 0.0 }
  0xde   :  { %v161_v49 = vpop.f32.mrf.mxu0 }
  0xdf   :  { %v1000_v50 = vpop.f32.mrf.mxu1  ;;  %v373_v53 = vadd.f32 %v997_v39, %v206_v47  ;;  %v204_v54 = vadd.f32 %v1319_v62, %v161_v49  ;;  %1022 = vmatprep.mubr.bf16.mxu0 %v396_v48  ;;  %v386_v61 = vmax.f32 %v370_v52, 0.0 }
  0xe0   :  { %v982_v56 = vpop.f32.mrf.mxu0  ;;  %1023 = vmatmul.mubr.bf16.gmra.mxu0 %v397_v51 }
  0xe1   :  { %v347_v57 = vpop.f32.mrf.mxu1  ;;  %v371_v58 = vadd.f32 %v334_v46, %v204_v54  ;;  %v389_v59 = vmax.f32 %v373_v53, 0.0  ;;  %v209_v2 = vadd.f32 %v982_v56, %v1319_v62 }
  0xe2   :  { %v174_v60 = vpop.f32.mrf.mxu0 }
  0xe3   :  { %v387_v63 = vmax.f32 %v371_v58, 0.0  ;;  %v207_v0 = vadd.f32 %v1319_v62, %v174_v60  ;;  %v1001_v3 = vpop.f32.mrf.mxu1  ;;  %v399_v7 = vpack.c.bf16 %v389_v59, %v388_v1  ;;  %v376_v12 = vadd.f32 %v1000_v50, %v209_v2 }
  0xe4   :  { %v983_v4 = vpop.f32.mrf.mxu0 }
  0xe5   :  { %v210_v5 = vadd.f32 %v983_v4, %v1319_v62  ;;  %v398_v6 = vpack.c.bf16 %v387_v63, %v386_v61  ;;  %v374_v9 = vadd.f32 %v347_v57, %v207_v0  ;;  %v350_v13 = vpop.f32.mrf.mxu1  ;;  %v392_v18 = vmax.f32 %v376_v12, 0.0 }
  0xe6   :  { %v177_v8 = vpop.f32.mrf.mxu0 }
  0xe7   :  { %v377_v10 = vadd.f32 %v1001_v3, %v210_v5  ;;  %v208_v11 = vadd.f32 %v1319_v62, %v177_v8  ;;  %1026 = vmatprep.mubr.bf16.mxu1 %v398_v6  ;;  %v390_v16 = vmax.f32 %v374_v9, 0.0 }
  0xe8   :  { %1027 = vmatmul.mubr.bf16.vlgmr.msra.gmra.mxu1 %v399_v7 }
  0xe9   :  { %v375_v14 = vadd.f32 %v350_v13, %v208_v11  ;;  %v393_v15 = vmax.f32 %v377_v10, 0.0 }
  0xeb   :  { %v391_v17 = vmax.f32 %v375_v14, 0.0  ;;  %v401_v20 = vpack.c.bf16 %v393_v15, %v392_v18 }
  0xed   :  { %v400_v19 = vpack.c.bf16 %v391_v17, %v390_v16 }
  0xef   :  { %1030 = vmatprep.mubr.bf16.mxu1 %v400_v19 }
  0xf0   :  { %1031 = vmatmul.mubr.bf16.gmra.mxu1 %v401_v20 }
 0x198   :  { %v1020_v22 = vpop.f32.mrf.mxu0 }
 0x199   :  { %v516_v62 = vadd.f32 %v1020_v22, %v1340_v21 }
 0x19a   :  { %v507_v23 = vpop.f32.mrf.mxu0 }
 0x19b   :  { %v572_v25 = vmax.f32 %v516_v62, 0.0  ;;  %v508_v26 = vadd.f32 %v1340_v21, %v507_v23  ;;  %v1382_v23 = vstv %s1447_s8 }
 0x19c   :  { %v1021_v27 = vpop.f32.mrf.mxu0 }
 0x19d   :  { %v570_v28 = vmax.f32 %v508_v26, 0.0  ;;  %v519_v29 = vadd.f32 %v1021_v27, %v1340_v21  ;;  %v595_v30 = vmul.f32 %v1346_v24, %v572_v25 }
 0x19e   :  { %v510_v31 = vpop.f32.mrf.mxu0 }
 0x19f   :  { %v573_v32 = vmax.f32 %v519_v29, 0.0  ;;  %v511_v33 = vadd.f32 %v1340_v21, %v510_v31  ;;  %613 = vadd.xlane.f32.xlu1 %v595_v30  ;;  %v593_v34 = vmul.f32 %v1346_v24, %v570_v28 }
 0x1a0   :  { %v1024_v35 = vpop.f32.mrf.mxu0 }
 0x1a1   :  { %v571_v36 = vmax.f32 %v511_v33, 0.0  ;;  %v532_v37 = vadd.f32 %v1024_v35, %v1340_v21  ;;  %609 = vadd.xlane.f32.xlu0 %v593_v34  ;;  %v596_v38 = vmul.f32 %v1346_v24, %v573_v32 }
 0x1a2   :  { %v523_v39 = vpop.f32.mrf.mxu0 }
 0x1a3   :  { %v576_v40 = vmax.f32 %v532_v37, 0.0  ;;  %v524_v41 = vadd.f32 %v1340_v21, %v523_v39  ;;  %615 = vadd.xlane.f32.xlu1 %v596_v38  ;;  %v594_v42 = vmul.f32 %v1346_v24, %v571_v36 }
 0x1a4   :  { %v1025_v43 = vpop.f32.mrf.mxu0 }
 0x1a5   :  { %v535_v44 = vadd.f32 %v1025_v43, %v1340_v21  ;;  %611 = vadd.xlane.f32.xlu0 %v594_v42  ;;  %v574_v46 = vmax.f32 %v524_v41, 0.0  ;;  %v599_v49 = vmul.f32 %v1346_v24, %v576_v40 }
 0x1a6   :  { %v526_v45 = vpop.f32.mrf.mxu0 }
 0x1a7   :  { %v577_v47 = vmax.f32 %v535_v44, 0.0  ;;  %v527_v48 = vadd.f32 %v1340_v21, %v526_v45  ;;  %v597_v57 = vmul.f32 %v1346_v24, %v574_v46 }
 0x1a8   :  { %v1028_v50 = vpop.f32.mrf.mxu1 }
 0x1a9   :  { %v575_v51 = vmax.f32 %v527_v48, 0.0  ;;  %v548_v52 = vadd.f32 %v1028_v50, %v1340_v21  ;;  %621 = vadd.xlane.f32.xlu0 %v599_v49  ;;  %v600_v53 = vmul.f32 %v1346_v24, %v577_v47 }
 0x1aa   :  { %v539_v54 = vpop.f32.mrf.mxu1 }
 0x1ab   :  { %v580_v55 = vmax.f32 %v548_v52, 0.0  ;;  %v540_v56 = vadd.f32 %v1340_v21, %v539_v54  ;;  %623 = vadd.xlane.f32.xlu1 %v600_v53  ;;  %v598_v60 = vmul.f32 %v1346_v24, %v575_v51 }
 0x1ac   :  { %v1029_v58 = vpop.f32.mrf.mxu1 }
 0x1ad   :  { %v551_v59 = vadd.f32 %v1029_v58, %v1340_v21  ;;  %617 = vadd.xlane.f32.xlu0 %v597_v57  ;;  %v578_v63 = vmax.f32 %v540_v56, 0.0  ;;  %v603_v2 = vmul.f32 %v1346_v24, %v580_v55 }
 0x1ae   :  { %v542_v61 = vpop.f32.mrf.mxu1 }
 0x1af   :  { %v581_v0 = vmax.f32 %v551_v59, 0.0  ;;  %v543_v1 = vadd.f32 %v1340_v21, %v542_v61  ;;  %619 = vadd.xlane.f32.xlu1 %v598_v60  ;;  %v601_v9 = vmul.f32 %v1346_v24, %v578_v63 }
 0x1b0   :  { %v1032_v3 = vpop.f32.mrf.mxu1 }
 0x1b1   :  { %v579_v4 = vmax.f32 %v543_v1, 0.0  ;;  %629 = vadd.xlane.f32.xlu0 %v603_v2  ;;  %v604_v5 = vmul.f32 %v1346_v24, %v581_v0  ;;  %v564_v7 = vadd.f32 %v1032_v3, %v1340_v21  ;;  %v771_v2 = vlaneseq }
 0x1b2   :  { %v555_v6 = vpop.f32.mrf.mxu1 }
 0x1b3   :  { %v556_v8 = vadd.f32 %v1340_v21, %v555_v6  ;;  %631 = vadd.xlane.f32.xlu1 %v604_v5  ;;  %v602_v12 = vmul.f32 %v1346_v24, %v579_v4  ;;  %v584_v14 = vmax.f32 %v564_v7, 0.0 }
 0x1b4   :  { %v1033_v10 = vpop.f32.mrf.mxu1 }
 0x1b5   :  { %v582_v11 = vmax.f32 %v556_v8, 0.0  ;;  %625 = vadd.xlane.f32.xlu0 %v601_v9  ;;  %v567_v15 = vadd.f32 %v1033_v10, %v1340_v21  ;;  %v607_v22 = vmul.f32 %v1346_v24, %v584_v14 }
 0x1b6   :  { %v558_v13 = vpop.f32.mrf.mxu1 }
 0x1b7   :  { %v559_v16 = vadd.f32 %v1340_v21, %v558_v13  ;;  %627 = vadd.xlane.f32.xlu1 %v602_v12  ;;  %v605_v17 = vmul.f32 %v1346_v24, %v582_v11  ;;  %v585_v19 = vmax.f32 %v567_v15, 0.0  ;;  %v1397_v12 = vand.u32 127, %v771_v2 }
 0x1b9   :  { %v583_v18 = vmax.f32 %v559_v16, 0.0  ;;  %633 = vadd.xlane.f32.xlu0 %v605_v17  ;;  %v608_v62 = vmul.f32 %v1346_v24, %v585_v19  ;;  %v777_v16 = vadd.s32 4294967288, %v1397_v12 }
 0x1bb   :  { %v606_v20 = vmul.f32 %v1346_v24, %v583_v18 }
 0x1bd   :  { %635 = vadd.xlane.f32.xlu1 %v606_v20  ;;  %637 = vadd.xlane.f32.xlu0 %v607_v22 }
 0x1c1   :  { %639 = vadd.xlane.f32.xlu1 %v608_v62 }
 0x228   :  { %v614_v21 = vpop.xlane.xlu1 %613 }
 0x229   :  { %v645_v25 = vadd.f32 %v1382_v23, %v614_v21  ;;  %v1402_v21 = vshrl.u32 %v771_v2, 7 }
 0x22a   :  { %v610_v26 = vpop.xlane.xlu0 %609 }
 0x22b   :  { %v918_v27 = vmul.f32 -1.442695, %v645_v25  ;;  %v643_v28 = vadd.f32 %v1382_v23, %v610_v26 }
 0x22c   :  { %v616_v29 = vpop.xlane.xlu1 %615 }
 0x22d   :  { %1060 = vpow2.f32 %v918_v27  ;;  %v916_v30 = vmul.f32 -1.442695, %v643_v28  ;;  %v646_v31 = vadd.f32 %v1382_v23, %v616_v29  ;;  %v784_v27 = vadd.s32 4294967280, %v1397_v12 }
 0x22e   :  { %v612_v32 = vpop.xlane.xlu0 %611 }
 0x22f   :  { %1062 = vpow2.f32 %v916_v30  ;;  %v919_v24 = vmul.f32 -1.442695, %v646_v31  ;;  %v644_v33 = vadd.f32 %v1382_v23, %v612_v32  ;;  %v780_v30 = vsub.s32 %v777_v16, %v1402_v21 }
 0x231   :  { %v917_v34 = vmul.f32 -1.442695, %v644_v33  ;;  %1064 = vpow2.f32 %v919_v24  ;;  %v775_v33 = vsub.s32 %v1397_v12, %v1402_v21 }
 0x232   :  { %v622_v35 = vpop.xlane.xlu0 %621 }
 0x233   :  { %1066 = vpow2.f32 %v917_v34  ;;  %v649_v36 = vadd.f32 %v1382_v23, %v622_v35  ;;  %v791_v35 = vadd.s32 4294967272, %v1397_v12 }
 0x234   :  { %v624_v37 = vpop.xlane.xlu1 %623 }
 0x235   :  { %v922_v38 = vmul.f32 -1.442695, %v649_v36  ;;  %v650_v39 = vadd.f32 %v1382_v23, %v624_v37  ;;  %v787_v37 = vsub.s32 %v784_v27, %v1402_v21 }
 0x236   :  { %v618_v40 = vpop.xlane.xlu0 %617 }
 0x237   :  { %1068 = vpow2.f32 %v922_v38  ;;  %v647_v41 = vadd.f32 %v1382_v23, %v618_v40  ;;  %v923_v43 = vmul.f32 -1.442695, %v650_v39  ;;  %v798_v40 = vadd.s32 4294967264, %v1397_v12 }
 0x238   :  { %v620_v42 = vpop.xlane.xlu1 %619 }
 0x239   :  { %v920_v44 = vmul.f32 -1.442695, %v647_v41  ;;  %v648_v45 = vadd.f32 %v1382_v23, %v620_v42 }
 0x23a   :  { %v1061_v46 = vpop.eup %1060  ;;  %v630_v47 = vpop.xlane.xlu0 %629 }
 0x23b   :  { %v709_v48 = vadd.f32 1.0, %v1061_v46  ;;  %1070 = vpow2.f32 %v920_v44  ;;  %v921_v49 = vmul.f32 -1.442695, %v648_v45  ;;  %v653_v50 = vadd.f32 %v1382_v23, %v630_v47 }
 0x23c   :  { %v1063_v51 = vpop.eup %1062  ;;  %v632_v52 = vpop.xlane.xlu1 %631  ;;  %1072 = vpow2.f32 %v923_v43  ;;  %v794_v45 = vsub.s32 %v791_v35, %v1402_v21 }
 0x23d   :  { %v707_v53 = vadd.f32 1.0, %v1063_v51  ;;  %v926_v54 = vmul.f32 -1.442695, %v653_v50  ;;  %v654_v55 = vadd.f32 %v1382_v23, %v632_v52  ;;  %1074 = vpow2.f32 %v921_v49 }
 0x23e   :  { %v626_v56 = vpop.xlane.xlu0 %625  ;;  %v1065_v57 = vpop.eup %1064  ;;  %1076 = vrcp.f32 %v709_v48  ;;  %v805_v49 = vadd.s32 4294967256, %v1397_v12  ;;  %v801_v52 = vsub.s32 %v798_v40, %v1402_v21  ;;  %v875_v40 = vadd.s32 4294967176, %v1397_v12 }
 0x23f   :  { %v927_v58 = vmul.f32 -1.442695, %v654_v55  ;;  %v651_v59 = vadd.f32 %v1382_v23, %v626_v56  ;;  %1078 = vpow2.f32 %v926_v54  ;;  %v710_v4 = vadd.f32 1.0, %v1065_v57 }
 0x240   :  { %v1067_v60 = vpop.eup %1066  ;;  %v628_v61 = vpop.xlane.xlu1 %627  ;;  %1080 = vrcp.f32 %v707_v53  ;;  %v812_v53 = vadd.s32 4294967248, %v1397_v12  ;;  %v819_v57 = vadd.s32 4294967240, %v1397_v12 }
 0x241   :  { %v708_v63 = vadd.f32 1.0, %v1067_v60  ;;  %v924_v0 = vmul.f32 -1.442695, %v651_v59  ;;  %v652_v1 = vadd.f32 %v1382_v23, %v628_v61  ;;  %1082 = vpow2.f32 %v927_v58 }
 0x242   :  { %v634_v3 = vpop.xlane.xlu0 %633  ;;  %v808_v60 = vsub.s32 %v805_v49, %v1402_v21 }
 0x243   :  { %1084 = vrcp.f32 %v708_v63  ;;  %v925_v5 = vmul.f32 -1.442695, %v652_v1  ;;  %v655_v6 = vadd.f32 %v1382_v23, %v634_v3  ;;  %v815_v1 = vsub.s32 %v812_v53, %v1402_v21 }
 0x244   :  { %v1069_v7 = vpop.eup %1068  ;;  %1086 = vpow2.f32 %v924_v0  ;;  %v826_v3 = vadd.s32 4294967232, %v1397_v12 }
 0x245   :  { %1088 = vpow2.f32 %v925_v5  ;;  %v928_v8 = vmul.f32 -1.442695, %v655_v6  ;;  %v713_v9 = vadd.f32 1.0, %v1069_v7  ;;  %v833_v7 = vadd.s32 4294967224, %v1397_v12 }
 0x246   :  { %v636_v10 = vpop.xlane.xlu1 %635  ;;  %v638_v11 = vpop.xlane.xlu0 %637  ;;  %1090 = vrcp.f32 %v710_v4 }
 0x247   :  { %v656_v13 = vadd.f32 %v1382_v23, %v636_v10  ;;  %v657_v14 = vadd.f32 %v1382_v23, %v638_v11  ;;  %1092 = vpow2.f32 %v928_v8  ;;  %v822_v10 = vsub.s32 %v819_v57, %v1402_v21 }
 0x248   :  { %v1071_v15 = vpop.eup %1070  ;;  %1094 = vrcp.f32 %v713_v9 }
 0x249   :  { %v711_v17 = vadd.f32 1.0, %v1071_v15  ;;  %v929_v18 = vmul.f32 -1.442695, %v656_v13  ;;  %v930_v19 = vmul.f32 -1.442695, %v657_v14  ;;  %v1073_v20 = vpop.eup %1072  ;;  %v840_v13 = vadd.s32 4294967216, %v1397_v12 }
 0x24a   :  { %v640_v22 = vpop.xlane.xlu1 %639  ;;  %v1075_v62 = vpop.eup %1074  ;;  %v714_v31 = vadd.f32 1.0, %v1073_v20  ;;  %v847_v14 = vadd.s32 4294967208, %v1397_v12  ;;  %v836_v20 = vsub.s32 %v833_v7, %v1402_v21 }
 0x24b   :  { %1096 = vrcp.f32 %v711_v17  ;;  %v658_v25 = vadd.f32 %v1382_v23, %v640_v22  ;;  %v1077_v26 = vpop.eup %1076  ;;  %v712_v28 = vadd.f32 1.0, %v1075_v62  ;;  %v854_v22 = vadd.s32 4294967200, %v1397_v12 }
 0x24c   :  { %1098 = vpow2.f32 %v929_v18  ;;  %v1079_v29 = vpop.eup %1078  ;;  %v788_v51 = vrot.slane %v1077_v26, %v787_v37  ;;  %v843_v26 = vsub.s32 %v840_v13, %v1402_v21 }
 0x24d   :  { %1100 = vpow2.f32 %v930_v19  ;;  %v931_v32 = vmul.f32 -1.442695, %v658_v25  ;;  %v1081_v24 = vpop.eup %1080  ;;  %v717_v23 = vadd.f32 1.0, %v1079_v29  ;;  %v829_v19 = vsub.s32 %v826_v3, %v1402_v21 }
 0x24e   :  { %1102 = vrcp.f32 %v712_v28  ;;  %v1083_v34 = vpop.eup %1082  ;;  %v776_v42 = vrot.slane %v1081_v24, %v775_v33  ;;  %v850_v29 = vsub.s32 %v847_v14, %v1402_v21  ;;  %v857_v35 = vsub.s32 %v854_v22, %v1402_v21 }
 0x24f   :  { %1104 = vpow2.f32 %v931_v32  ;;  %v718_v43 = vadd.f32 1.0, %v1083_v34  ;;  %v861_v32 = vadd.s32 4294967192, %v1397_v12 }
 0x250   :  { %v1085_v36 = vpop.eup %1084  ;;  %1106 = vrcp.f32 %v714_v31 }
 0x251   :  { %v1087_v38 = vpop.eup %1086  ;;  %v781_v39 = vrot.slane %v1085_v36, %v780_v30  ;;  %1108 = vrcp.f32 %v717_v23  ;;  %v868_v23 = vadd.s32 4294967184, %v1397_v12 }
 0x252   :  { %v1089_v41 = vpop.eup %1088  ;;  %v715_v44 = vadd.f32 1.0, %v1087_v38 }
 0x253   :  { %v716_v46 = vadd.f32 1.0, %v1089_v41  ;;  %v1091_v47 = vpop.eup %1090  ;;  %v783_v48 = vsel %vm782_vm3, %v781_v39, %v776_v42 }
 0x254   :  { %1110 = vrcp.f32 %v715_v44  ;;  %v1093_v50 = vpop.eup %1092  ;;  %v790_v56 = vsel %vm789_vm4, %v788_v51, %v783_v48  ;;  %v795_v59 = vrot.slane %v1091_v47, %v794_v45  ;;  %v871_v45 = vsub.s32 %v868_v23, %v1402_v21 }
 0x255   :  { %1112 = vrcp.f32 %v716_v46  ;;  %v719_v54 = vadd.f32 1.0, %v1093_v50  ;;  %v1095_v55 = vpop.eup %1094  ;;  %v878_v48 = vsub.s32 %v875_v40, %v1402_v21 }
 0x256   :  { %1114 = vrcp.f32 %v718_v43  ;;  %v797_v2 = vsel %vm796_vm5, %v795_v59, %v790_v56  ;;  %v816_v17 = vrot.slane %v1095_v55, %v815_v1  ;;  %v864_v43 = vsub.s32 %v861_v32, %v1402_v21 }
 0x257   :  { %1116 = vrcp.f32 %v719_v54 }
 0x258   :  { %v1097_v58 = vpop.eup %1096 }
 0x259   :  { %v1099_v61 = vpop.eup %1098  ;;  %v802_v63 = vrot.slane %v1097_v58, %v801_v52 }
 0x25a   :  { %v1101_v0 = vpop.eup %1100  ;;  %v720_v4 = vadd.f32 1.0, %v1099_v61 }
 0x25b   :  { %v1103_v5 = vpop.eup %1102  ;;  %v804_v6 = vsel %vm803_vm6, %v802_v63, %v797_v2  ;;  %v721_v8 = vadd.f32 1.0, %v1101_v0 }
 0x25c   :  { %v1105_v9 = vpop.eup %1104  ;;  %v809_v11 = vrot.slane %v1103_v5, %v808_v60  ;;  %1118 = vrcp.f32 %v720_v4 }
 0x25d   :  { %1120 = vrcp.f32 %v721_v8  ;;  %v722_v15 = vadd.f32 1.0, %v1105_v9  ;;  %v1107_v16 = vpop.eup %1106 }
 0x25e   :  { %v811_v18 = vsel %vm810_vm7, %v809_v11, %v804_v6  ;;  %v1109_v62 = vpop.eup %1108  ;;  %v823_v28 = vrot.slane %v1107_v16, %v822_v10 }
 0x25f   :  { %1122 = vrcp.f32 %v722_v15  ;;  %v818_v25 = vsel %vm817_vm8, %v816_v17, %v811_v18  ;;  %v844_v36 = vrot.slane %v1109_v62, %v843_v26 }
 0x260   :  { %v825_v33 = vsel %vm824_vm9, %v823_v28, %v818_v25 }
 0x261   :  { %v1111_v27 = vpop.eup %1110 }
 0x262   :  { %v1113_v30 = vpop.eup %1112  ;;  %v830_v31 = vrot.slane %v1111_v27, %v829_v19 }
 0x263   :  { %v1115_v24 = vpop.eup %1114  ;;  %v837_v34 = vrot.slane %v1113_v30, %v836_v20 }
 0x264   :  { %v832_v37 = vsel %vm831_vm10, %v830_v31, %v825_v33  ;;  %v1117_v38 = vpop.eup %1116  ;;  %v851_v41 = vrot.slane %v1115_v24, %v850_v29 }
 0x265   :  { %v839_v39 = vsel %vm838_vm11, %v837_v34, %v832_v37  ;;  %v858_v44 = vrot.slane %v1117_v38, %v857_v35 }
 0x266   :  { %v846_v42 = vsel %vm845_vm12, %v844_v36, %v839_v39 }
 0x267   :  { %v853_v46 = vsel %vm852_vm13, %v851_v41, %v846_v42 }
 0x268   :  { %v860_v51 = vsel %vm859_vm14, %v858_v44, %v853_v46 }
 0x269   :  { %v1119_v47 = vpop.eup %1118 }
 0x26a   :  { %v1121_v49 = vpop.eup %1120  ;;  %v865_v50 = vrot.slane %v1119_v47, %v864_v43 }
 0x26b   :  { %v872_v52 = vrot.slane %v1121_v49, %v871_v45 }
 0x26c   :  { %v1123_v53 = vpop.eup %1122  ;;  %v867_v12 = vsel %vm866_vm15, %v865_v50, %v860_v51 }
 0x26d   :  { %v879_v54 = vrot.slane %v1123_v53, %v878_v48  ;;  %v874_v55 = vsel %vm873_vm0, %v872_v52, %v867_v12 }
 0x26f   :  { %v881_v56 = vsel %vm880_vm1, %v879_v54, %v874_v55 }
 0x270   :  { %883 = vst [vmem:[%s1448_s9] sm:$0x1] %v881_v56 }

</bundles_post_ra>
